<compile_context>
chip_gen: v5e
topology: v5e:2x2
jax: 0.10.0
libtpu: 0.0.40
codegen_flags: <defaults>
</compile_context>

<pallas_src>
import functools

import jax
import jax.numpy as jnp
import numpy as np
from jax import lax
from jax.experimental import pallas as pl
from jax.experimental.pallas import tpu as pltpu

_LANES = 128


# ----------------------------- Pallas kernel ------------------------------- #
def _sin_relation_kernel(x_ref, o_ref, *, D, c_ix, ct_ix, lo, hi, offset):
    """Box-squash + sin-relation on one lane-dense (bm, 128) tile.

    D, c_ix, ct_ix are static ints; lo/hi/offset static floats.
    Original column index of lane i is (i % D) because 128 % D == 0.
    """
    x = x_ref[...].astype(jnp.float32)                    # (bm, 128)

    # Constrained-column lane mask (static pattern given c_ix and D).
    col = lax.broadcasted_iota(jnp.int32, x.shape, 1) % D
    c_mask = col == c_ix

    def softplus(z):                                      # stable log(1 + exp(z))
        return jnp.maximum(z, 0.0) + jnp.log1p(jnp.exp(-jnp.abs(z)))

    # Box transform; only values on constrained lanes are kept by the select.
    boxed = -softplus(-softplus(x - lo) + offset) + hi

    # sin of the constrained_to column, shifted so it lands on the constrained
    # lane of the same original row: for lane i (i % D == c_ix) we need
    # sin(x[:, i + (ct_ix - c_ix)]).  Each original row of D features lives
    # inside one 128-lane row (128 % D == 0), so no wrap for the lanes we use.
    dlt = ct_ix - c_ix
    s = jnp.roll(jnp.sin(x), shift=-dlt, axis=1)          # s[:, i] = sin(x[:, i + dlt])

    o_ref[...] = jnp.where(c_mask, boxed + s, x).astype(o_ref.dtype)


def sin_relation_pallas(x, constrained_ix, constrained_to_ix,
                        lo=-0.1, hi=0.1, bm=1024):
    """x: (B, D) float array. Returns (B, D) SinRelation forward output."""
    B, D = x.shape
    c_ix, ct_ix = int(constrained_ix), int(constrained_to_ix)
    assert c_ix != ct_ix, "constrained and constrained_to columns must differ"
    assert 0 <= c_ix < D and 0 <= ct_ix < D
    assert _LANES % D == 0, "lane-dense layout needs D | 128"
    # TODO(synk): add a (bm, D)-blocked fallback path for 128 % D != 0.

    total = B * D
    n_rows = pl.cdiv(total, _LANES)

    # Row tile: as big as requested (VMEM-cheap) but never larger than the
    # (8-row aligned) data; always a multiple of 8 sublanes.
    bm = max(8, min(int(bm) // 8 * 8, pl.cdiv(n_rows, 8) * 8))
    rows_padded = pl.cdiv(n_rows, bm) * bm

    xf = x.reshape(-1)
    pad = rows_padded * _LANES - total
    if pad:
        # Ragged shapes: pad the flat view; pad values go through the same
        # elementwise math and are discarded below.
        xf = jnp.pad(xf, (0, pad))
    xf = xf.reshape(rows_padded, _LANES)

    offset = float(np.log(np.expm1(hi - lo)))

    kernel = functools.partial(
        _sin_relation_kernel, D=D, c_ix=c_ix, ct_ix=ct_ix,
        lo=float(lo), hi=float(hi), offset=offset)

    out = pl.pallas_call(
        kernel,
        out_shape=jax.ShapeDtypeStruct((rows_padded, _LANES), x.dtype),
        grid=(rows_padded // bm,),
        in_specs=[pl.BlockSpec((bm, _LANES), lambda i: (i, 0))],
        out_specs=pl.BlockSpec((bm, _LANES), lambda i: (i, 0)),
        compiler_params=pltpu.CompilerParams(
            dimension_semantics=("parallel",)),
    )(xf)

    out = out.reshape(-1)
    if pad:
        out = out[:total]
    return out.reshape(B, D)


# ----------------- Pure-JAX reference (faithful to PyTorch) ----------------- #
def _softplus_ref(z):
    return jnp.logaddexp(z, 0.0)


def sin_relation_ref(x, constrained_ixs, constrained_to, not_constrained_ixs,
                     lims=((-0.1, 0.1),)):
    lims = jnp.asarray(lims, dtype=jnp.float32)      # (1, 2)

    # --- Box(constrained_ixs, constrained_to + not_constrained_ixs) ---
    box_not_constrained = list(constrained_to) + list(not_constrained_ixs)
    fwd_box = list(constrained_ixs) + box_not_constrained
    rev_box = np.argsort(fwd_box)

    split1 = x[:, np.asarray(constrained_ixs)]
    split2 = x[:, np.asarray(box_not_constrained)]
    greater_than = _softplus_ref(split1 - lims[:, 0][None, :])
    offset = jnp.log(jnp.exp(lims[:, 1][None, :] - lims[:, 0][None, :]) - 1.0)
    less_than = -_softplus_ref(-greater_than + offset) + lims[:, 1][None, :]
    restricted = jnp.concatenate((less_than, split2), axis=1)[:, rev_box]

    # --- SinRelation ---
    fwd = list(constrained_ixs) + list(constrained_to) + list(not_constrained_ixs)
    rev = np.argsort(fwd)
    s1 = restricted[:, np.asarray(constrained_ixs)]
    s2 = restricted[:, np.asarray(constrained_to)]
    s3 = restricted[:, np.asarray(not_constrained_ixs)]
    return jnp.concatenate((s1 + jnp.sin(s2), s2, s3), axis=1)[:, rev]


# ---------------------------------- main ----------------------------------- #
if __name__ == "__main__":
    # Module config: D = 8 features; indices form a permutation of range(D).
    constrained_ixs = [2]
    constrained_to = [5]
    not_constrained_ixs = [0, 1, 3, 4, 6, 7]
    D = 8

    key = jax.random.PRNGKey(0)
    configs = [
        dict(B=50, bm=1024),     # ragged batch -> exercises the padding path
        dict(B=2048, bm=1024),   # single lane-dense tile
        dict(B=4096, bm=128),    # multi-step grid (2 iterations)
    ]
    for cfg in configs:
        key, sub = jax.random.split(key)
        x = jax.random.normal(sub, (cfg["B"], D), dtype=jnp.float32)

        out = sin_relation_pallas(x, constrained_ixs[0], constrained_to[0],
                                  lo=-0.1, hi=0.1, bm=cfg["bm"])
        out = jax.block_until_ready(out)

        ref = sin_relation_ref(x, constrained_ixs, constrained_to,
                               not_constrained_ixs, lims=[(-0.1, 0.1)])
        np.testing.assert_allclose(np.asarray(out), np.asarray(ref),
                                   rtol=1e-5, atol=1e-5)

    print("KERNEL_OK")
</pallas_src>

<mosaic_0001>
module attributes {stable_mosaic.version = 11 : i64} {
  func.func @_sin_relation_kernel(%arg0: i32, %arg1: memref<8x128xf32, #tpu.memory_space<vmem>>, %arg2: memref<8x128xf32, #tpu.memory_space<vmem>>) attributes {dimension_semantics = [#tpu.dimension_semantics<parallel>], iteration_bounds = array<i64: 1>, scalar_prefetch = 0 : i64, scratch_operands = 0 : i64, tpu.core_type = #tpu.core_type<tc>, window_params = [{transform_indices = @transform_0, window_bounds = array<i64: 8, 128>}, {transform_indices = @transform_1, window_bounds = array<i64: 8, 128>}]} {
    %c0 = arith.constant 0 : index
    %c0_0 = arith.constant 0 : index
    %0 = vector.load %arg1[%c0, %c0_0] : memref<8x128xf32, #tpu.memory_space<vmem>>, vector<8x128xf32>
    %1 = tpu.iota {dimensions = array<i32: 1>} : vector<8x128xi32>
    %c8_i32 = arith.constant 8 : i32
    %c0_i32 = arith.constant 0 : i32
    %2 = arith.cmpi eq, %c8_i32, %c0_i32 : i32
    %c1_i32 = arith.constant 1 : i32
    %3 = arith.select %2, %c1_i32, %c8_i32 : i32
    %4 = vector.broadcast %3 : i32 to vector<8x128xi32>
    %5 = arith.remsi %1, %4 : vector<8x128xi32>
    %c0_i32_1 = arith.constant 0 : i32
    %6 = vector.broadcast %c0_i32_1 : i32 to vector<8x128xi32>
    %7 = arith.cmpi ne, %5, %6 : vector<8x128xi32>
    %c0_i32_2 = arith.constant 0 : i32
    %8 = vector.broadcast %c0_i32_2 : i32 to vector<8x128xi32>
    %9 = arith.cmpi slt, %5, %8 : vector<8x128xi32>
    %c0_i32_3 = arith.constant 0 : i32
    %10 = arith.cmpi slt, %3, %c0_i32_3 : i32
    %11 = vector.broadcast %10 : i1 to vector<8x128xi1>
    %12 = vector.broadcast %11 : vector<8x128xi1> to vector<8x128xi1>
    %13 = arith.xori %9, %12 : vector<8x128xi1>
    %14 = arith.andi %13, %7 : vector<8x128xi1>
    %15 = vector.broadcast %3 : i32 to vector<8x128xi32>
    %16 = arith.addi %5, %15 : vector<8x128xi32>
    %17 = arith.select %14, %16, %5 : vector<8x128xi1>, vector<8x128xi32>
    %c2_i32 = arith.constant 2 : i32
    %18 = vector.broadcast %c2_i32 : i32 to vector<8x128xi32>
    %19 = arith.cmpi eq, %17, %18 : vector<8x128xi32>
    %cst = arith.constant -1.000000e-01 : f32
    %20 = vector.broadcast %cst : f32 to vector<8x128xf32>
    %21 = arith.subf %0, %20 : vector<8x128xf32>
    %cst_4 = arith.constant 0.000000e+00 : f32
    %22 = vector.broadcast %cst_4 : f32 to vector<8x128xf32>
    %23 = arith.maximumf %21, %22 : vector<8x128xf32>
    %24 = math.absf %21 : vector<8x128xf32>
    %cst_5 = arith.constant 0.000000e+00 : f32
    %25 = vector.broadcast %cst_5 : f32 to vector<8x128xf32>
    %26 = arith.subf %25, %24 : vector<8x128xf32>
    %27 = math.exp %26 : vector<8x128xf32>
    %28 = math.log1p %27 : vector<8x128xf32>
    %29 = arith.addf %23, %28 : vector<8x128xf32>
    %cst_6 = arith.constant 0.000000e+00 : f32
    %30 = vector.broadcast %cst_6 : f32 to vector<8x128xf32>
    %31 = arith.subf %30, %29 : vector<8x128xf32>
    %cst_7 = arith.constant -1.50777185 : f32
    %32 = vector.broadcast %cst_7 : f32 to vector<8x128xf32>
    %33 = arith.addf %31, %32 : vector<8x128xf32>
    %cst_8 = arith.constant 0.000000e+00 : f32
    %34 = vector.broadcast %cst_8 : f32 to vector<8x128xf32>
    %35 = arith.maximumf %33, %34 : vector<8x128xf32>
    %36 = math.absf %33 : vector<8x128xf32>
    %cst_9 = arith.constant 0.000000e+00 : f32
    %37 = vector.broadcast %cst_9 : f32 to vector<8x128xf32>
    %38 = arith.subf %37, %36 : vector<8x128xf32>
    %39 = math.exp %38 : vector<8x128xf32>
    %40 = math.log1p %39 : vector<8x128xf32>
    %41 = arith.addf %35, %40 : vector<8x128xf32>
    %cst_10 = arith.constant 0.000000e+00 : f32
    %42 = vector.broadcast %cst_10 : f32 to vector<8x128xf32>
    %43 = arith.subf %42, %41 : vector<8x128xf32>
    %cst_11 = arith.constant 1.000000e-01 : f32
    %44 = vector.broadcast %cst_11 : f32 to vector<8x128xf32>
    %45 = arith.addf %43, %44 : vector<8x128xf32>
    %46 = math.sin %0 : vector<8x128xf32>
    %47 = vector.extract_strided_slice %46 {offsets = [0, 3], sizes = [8, 125], strides = [1, 1]} : vector<8x128xf32> to vector<8x125xf32>
    %48 = vector.extract_strided_slice %46 {offsets = [0, 0], sizes = [8, 3], strides = [1, 1]} : vector<8x128xf32> to vector<8x3xf32>
    %49 = tpu.concatenate %47, %48 in 1 : vector<8x125xf32>, vector<8x3xf32> -> vector<8x128xf32>
    %50 = arith.addf %45, %49 : vector<8x128xf32>
    %51 = arith.select %19, %50, %0 : vector<8x128xi1>, vector<8x128xf32>
    %c0_12 = arith.constant 0 : index
    %c0_13 = arith.constant 0 : index
    %52 = vector.load %arg2[%c0_12, %c0_13] : memref<8x128xf32, #tpu.memory_space<vmem>>, vector<8x128xf32>
    tpu.vector_store %arg2[%c0_12, %c0_13], %51 {strides = array<i32>} : memref<8x128xf32, #tpu.memory_space<vmem>>, vector<8x128xf32>,
    return
  }
  func.func @transform_0(%arg0: i32) -> (i32, i32) {
    %c0_i32 = arith.constant 0 : i32
    %c0_i32_0 = arith.constant 0 : i32
    return %arg0, %c0_i32 : i32, i32
  }
  func.func @transform_1(%arg0: i32) -> (i32, i32) {
    %c0_i32 = arith.constant 0 : i32
    %c0_i32_0 = arith.constant 0 : i32
    return %arg0, %c0_i32 : i32, i32
  }
}

</mosaic_0001>

<bundles_post_ra>
// kernel: tpu_custom_call.1
= control target key start
LH: loop header
LB: loop body
LE: loop exit
PB: predicated region body
PF: predicated region fallthrough
CT: control target
= control target key end

     0   :  { %6 = vsyncpa [#allocation3], 0  ;;  %s401_s0 = inlined_call_operand.hbm [shape: f32[8,128], index: 0, kind: input, shape index: {}]   ;;  %s402_s1 = inlined_call_operand.hbm [shape: f32[8,128], index: 1, kind: output, shape index: {}]  }
   0x1   :  { %7 = vsyncpa [#allocation4], 0  ;;  %s13_s8 = sshll.u32 %s401_s0, 4  ;;  %s327_s9 = smov [#allocation2]   ;;  %s14_s8 = int_to_ptr.hbm [resolvable:$true] %s13_s8 }
   0x2   :  { %s15_s10 = sshll.u32 %s327_s9, 4  ;;  %s16_s10 = int_to_ptr.vmem [resolvable:$true] %s15_s10 }
   0x3   :  { %18 = dma.hbm_to_vmem [thread:$0]  %s14_s8, 128, %s16_s10, [#allocation3]  }
   0x4   :  { %323 = dma.done.wait [#allocation3], 128  }
   0x5   :  { %324 = vsyncadd [#allocation3], 4294967168  ;;  %v350_v0 = vld [vmem:[#allocation2] sm:$0xff]  ;;  %v328_v12 = vmov 683565275   ;;  %s335_s0 = smov 125  }
   0x6   :  { %v77_v1 = vand.u32 2139095040, %v350_v0  ;;  %v74_v3 = vand.u32 2147483647, %v350_v0  ;;  %v329_v14 = vmov 2475754826   ;;  %vm76_vm12 = vcmp.lt.s32.totalorder %v350_v0, 0 }
   0x7   :  { %v330_v16 = vmov 2131351028   ;;  %v331_v18 = vmov 2102212464   ;;  %v332_v20 = vmov 920167782  }
   0x8   :  { %v78_v2 = vshrl.u32 %v77_v1, 23  ;;  %v81_v6 = vand.u32 8388607, %v74_v3  ;;  %v333_v26 = vmov 1326507024   ;;  %v334_v1 = vmov 0  }
   0x9   :  { %vm75_vm13 = vcmp.le.f32.partialorder %v74_v3, 0.7853982  ;;  %s336_s11 = smov [#allocation5]   ;;  %s243_s15 = sshll.u32 %s402_s1, 4  ;;  %s244_s15 = int_to_ptr.hbm [resolvable:$true] %s243_s15 }
   0xa   :  { %v254_v4 = vadd.s32 4294967169, %v78_v2  ;;  %v82_v9 = vor.u32 8388608, %v81_v6  ;;  %s241_s12 = sshll.u32 %s336_s11, 4  ;;  %s242_s12 = int_to_ptr.vmem [resolvable:$true] %s241_s12 }
   0xc   :  { %v84_v5 = vadd.s32 1, %v254_v4  ;;  %v359_v28 = vshll.u32 %v82_v9, 8 }
   0xe   :  { %vm85_vm0 = vcmp.gt.s32.totalorder %v84_v5, 0  ;;  %v123_v40 = vand.u32 65535, %v359_v28  ;;  %v124_v41 = vshrl.u32 %v359_v28, 16 }
   0xf   :  { %v86_v7 = vsel %vm85_vm0, %v84_v5, 0 }
  0x10   :  { %v88_v8 = vand.u32 31, %v86_v7  ;;  %v356_v10 = vshrl.u32 %v86_v7, 5 }
  0x12   :  { %v89_v11 = vsub.s32 32, %v88_v8  ;;  %v91_v13 = vshll.u32 %v328_v12, %v88_v8  ;;  %v94_v15 = vshll.u32 %v329_v14, %v88_v8  ;;  %v97_v17 = vshll.u32 %v330_v16, %v88_v8 }
  0x13   :  { %v100_v19 = vshll.u32 %v331_v18, %v88_v8  ;;  %v103_v21 = vshll.u32 %v332_v20, %v88_v8  ;;  %vm106_vm1 = vcmp.lt.s32.totalorder %v356_v10, 1  ;;  %vm109_vm2 = vcmp.lt.s32.totalorder %v356_v10, 4 }
  0x14   :  { %v92_v22 = vshrl.u32 %v329_v14, %v89_v11  ;;  %v95_v23 = vshrl.u32 %v330_v16, %v89_v11  ;;  %v98_v24 = vshrl.u32 %v331_v18, %v89_v11  ;;  %v101_v25 = vshrl.u32 %v332_v20, %v89_v11 }
  0x15   :  { %v104_v27 = vshrl.u32 %v333_v26, %v89_v11  ;;  %vm108_vm3 = vcmp.lt.s32.totalorder %v356_v10, 3  ;;  %vm107_vm4 = vcmp.lt.s32.totalorder %v356_v10, 2  ;;  %v90_v48 = vshrl.u32 %v328_v12, %v89_v11 }
  0x16   :  { %v93_v29 = vor.u32 %v92_v22, %v91_v13  ;;  %v96_v30 = vor.u32 %v95_v23, %v94_v15  ;;  %v99_v31 = vor.u32 %v98_v24, %v97_v17  ;;  %v102_v32 = vor.u32 %v101_v25, %v100_v19 }
  0x17   :  { %v105_v33 = vor.u32 %v104_v27, %v103_v21 }
  0x18   :  { %v114_v34 = vsel %vm106_vm1, %v93_v29, %v96_v30  ;;  %v118_v35 = vsel %vm106_vm1, %v96_v30, %v99_v31  ;;  %v115_v36 = vsel %vm109_vm2, %v102_v32, 920167782  ;;  %v110_v61 = vsel %vm106_vm1, %v90_v48, %v93_v29 }
  0x19   :  { %v119_v37 = vsel %vm109_vm2, %v105_v33, 1326507024  ;;  %v116_v38 = vsel %vm108_vm3, %v99_v31, %v115_v36  ;;  %v111_v63 = vsel %vm109_vm2, %v99_v31, 2102212464  ;;  %vm217_vm1 = vweird.f32 %v350_v0 }
  0x1a   :  { %v120_v39 = vsel %vm108_vm3, %v102_v32, %v119_v37  ;;  %v117_v42 = vsel %vm107_vm4, %v114_v34, %v116_v38  ;;  %v112_v12 = vsel %vm108_vm3, %v96_v30, %v111_v63 }
  0x1b   :  { %v121_v43 = vsel %vm107_vm4, %v118_v35, %v120_v39  ;;  %v147_v46 = vand.u32 65535, %v117_v42  ;;  %v148_v47 = vshrl.u32 %v117_v42, 16  ;;  %v113_v20 = vsel %vm107_vm4, %v110_v61, %v112_v12 }
  0x1c   :  { %v125_v44 = vand.u32 65535, %v121_v43  ;;  %v126_v45 = vshrl.u32 %v121_v43, 16  ;;  %v167_v24 = vmul.u32 %v359_v28, %v113_v20 }
  0x1d   :  { %v149_v52 = vmul.u32 %v147_v46, %v123_v40  ;;  %v150_v53 = vmul.u32 %v148_v47, %v123_v40  ;;  %v151_v54 = vmul.u32 %v147_v46, %v124_v41  ;;  %v152_v58 = vmul.u32 %v148_v47, %v124_v41 }
  0x1e   :  { %v127_v49 = vmul.u32 %v125_v44, %v123_v40  ;;  %v128_v50 = vmul.u32 %v126_v45, %v123_v40  ;;  %v129_v51 = vmul.u32 %v125_v44, %v124_v41  ;;  %v130_v55 = vmul.u32 %v126_v45, %v124_v41 }
  0x1f   :  { %v153_v59 = vshll.u32 %v150_v53, 16  ;;  %v155_v60 = vshll.u32 %v151_v54, 16  ;;  %v154_v9 = vshrl.u32 %v150_v53, 16  ;;  %v156_v16 = vshrl.u32 %v151_v54, 16 }
  0x20   :  { %v131_v56 = vshll.u32 %v128_v50, 16  ;;  %v133_v57 = vshll.u32 %v129_v51, 16  ;;  %v132_v5 = vshrl.u32 %v128_v50, 16  ;;  %v134_v13 = vshrl.u32 %v129_v51, 16 }
  0x21   :  { %vm157_vm6 = vc.u32 %v149_v52, %v153_v59  ;;  %v159_v4 = vadd.s32 %v153_v59, %v149_v52 }
  0x22   :  { %vm135_vm5 = vc.u32 %v127_v49, %v131_v56  ;;  %v137_v62 = vadd.s32 %v131_v56, %v127_v49  ;;  %v158_v7 = vsel %vm157_vm6, 1, %v334_v1 }
  0x23   :  { %v136_v2 = vsel %vm135_vm5, 1, %v334_v1  ;;  %v160_v11 = vadd.s32 %v158_v7, %v152_v58  ;;  %vm161_vm8 = vc.u32 %v159_v4, %v155_v60  ;;  %v163_v19 = vadd.s32 %v159_v4, %v155_v60 }
  0x24   :  { %v138_v6 = vadd.s32 %v136_v2, %v130_v55  ;;  %vm139_vm7 = vc.u32 %v137_v62, %v133_v57  ;;  %v162_v15 = vsel %vm161_vm8, 1, %v334_v1 }
  0x25   :  { %v140_v8 = vsel %vm139_vm7, 1, %v334_v1  ;;  %v164_v17 = vadd.s32 %v162_v15, %v160_v11 }
  0x26   :  { %v142_v14 = vadd.s32 %v140_v8, %v138_v6 }
  0x27   :  { %v165_v21 = vadd.s32 %v164_v17, %v154_v9 }
  0x28   :  { %v143_v18 = vadd.s32 %v142_v14, %v132_v5  ;;  %v253_v14 = vadd.f32 0.1, %v350_v0 }
  0x29   :  { %v166_v23 = vadd.s32 %v165_v21, %v156_v16 }
  0x2a   :  { %v144_v22 = vadd.s32 %v143_v18, %v134_v13  ;;  %v41_v15 = vand.u32 2147483647, %v253_v14 }
  0x2b   :  { %v170_v25 = vadd.s32 1, %v166_v23 }
  0x2c   :  { %vm169_vm9 = vc.u32 %v144_v22, %v163_v19  ;;  %v168_v10 = vadd.s32 %v163_v19, %v144_v22  ;;  %v42_v16 = vsub.f32 0.0, %v41_v15 }
  0x2d   :  { %v171_v26 = vsel %vm169_vm9, %v170_v25, %v166_v23 }
  0x2e   :  { %v172_v27 = vadd.s32 %v171_v26, %v167_v24  ;;  %v43_v17 = vmul.f32 1.442695, %v42_v16  ;;  %v40_v26 = vmax.f32 %v253_v14, 0.0 }
  0x30   :  { %v173_v29 = vadd.s32 536870912, %v172_v27  ;;  %267 = vpow2.f32 %v43_v17 }
  0x32   :  { %v174_v30 = vshrl.u32 %v173_v29, 30 }
  0x34   :  { %v175_v31 = vshll.u32 %v174_v30, 30  ;;  %v198_v48 = vsub.s32 4, %v174_v30 }
  0x36   :  { %v176_v32 = vsub.s32 %v172_v27, %v175_v31  ;;  %v199_v51 = vsel %vm76_vm12, %v198_v48, %v174_v30  ;;  %v268_v18 = vpop.eup %267 }
  0x37   :  { %v201_v54 = vsel %vm75_vm13, 0, %v199_v51  ;;  %v45_v19 = vadd.f32 1.0, %v268_v18  ;;  %v48_v20 = vmul.f32 -0.5, %v268_v18  ;;  %v51_v23 = vand.u32 2147483647, %v268_v18 }
  0x38   :  { %vm177_vm10 = vcmp.lt.s32.totalorder %v176_v32, 0  ;;  %v178_v33 = vsub.s32 0, %v176_v32  ;;  %v218_v59 = vadd.s32 3, %v201_v54 }
  0x39   :  { %269 = vlog2.f32 %v45_v19  ;;  %v49_v21 = vadd.f32 1.0, %v48_v20  ;;  %vm52_vm2 = vcmp.lt.f32.partialorder %v51_v23, 0.0004427343 }
  0x3a   :  { %v179_v34 = vsel %vm177_vm10, %v178_v33, %v176_v32  ;;  %v219_v1 = vand.u32 3, %v218_v59 }
  0x3b   :  { %v180_v35 = vclz %v179_v34  ;;  %v50_v25 = vmul.f32 %v268_v18, %v49_v21 }
  0x3c   :  { %vm224_vm14 = vcmp.eq.s32.totalorder %v219_v1, 2  ;;  %vm221_vm15 = vcmp.eq.s32.totalorder %v219_v1, 0  ;;  %vm220_vm0 = vcmp.lt.s32.totalorder %v219_v1, 2 }
  0x3d   :  { %v255_v36 = vadd.s32 4294967294, %v180_v35 }
  0x3f   :  { %vm256_vm11 = vcmp.lt.s32.totalorder %v255_v36, 0  ;;  %v270_v22 = vpop.eup %269 }
  0x40   :  { %v183_v37 = vsel %vm256_vm11, 0, %v255_v36  ;;  %v47_v24 = vmul.f32 0.6931472, %v270_v22 }
  0x41   :  { %v184_v38 = vsub.s32 32, %v183_v37  ;;  %v185_v39 = vshll.u32 %v176_v32, %v183_v37  ;;  %v188_v40 = vsub.s32 4294967266, %v183_v37 }
  0x42   :  { %v53_v27 = vsel %vm52_vm2, %v50_v25, %v47_v24 }
  0x43   :  { %v186_v28 = vshrl.u32 %v168_v10, %v184_v38  ;;  %v189_v41 = vadd.s32 127, %v188_v40  ;;  %v54_v29 = vadd.f32 %v53_v27, %v40_v26 }
  0x45   :  { %v187_v42 = vor.u32 %v186_v28, %v185_v39  ;;  %v190_v43 = vshll.u32 %v189_v41, 23  ;;  %v55_v30 = vsub.f32 0.0, %v54_v29 }
  0x47   :  { %v191_v44 = vor.u32 4788187, %v190_v43  ;;  %v194_v45 = vcvt.s32.f32 %v187_v42  ;;  %v56_v31 = vadd.f32 -1.5077718, %v55_v30  ;;  %v24_v43 = vlaneseq }
  0x49   :  { %v192_v46 = vand.u32 2147483647, %v191_v44  ;;  %v58_v32 = vand.u32 2147483647, %v56_v31  ;;  %v57_v41 = vmax.f32 %v56_v31, 0.0 }
  0x4b   :  { %v195_v47 = vmul.f32 %v194_v45, %v192_v46  ;;  %v59_v33 = vsub.f32 0.0, %v58_v32  ;;  %v25_v45 = vand.u32 127, %v24_v43 }
  0x4d   :  { %v196_v49 = vxor.u32 2147483648, %v195_v47  ;;  %v60_v34 = vmul.f32 1.442695, %v59_v33 }
  0x4f   :  { %v197_v50 = vsel %vm76_vm12, %v196_v49, %v195_v47  ;;  %271 = vpow2.f32 %v60_v34  ;;  %v30_v47 = vand.u32 7, %v25_v45 }
  0x50   :  { %v200_v52 = vsel %vm75_vm13, %v350_v0, %v197_v50 }
  0x51   :  { %v202_v53 = vmul.f32 %v200_v52, %v200_v52  ;;  %vm38_vm4 = vcmp.eq.s32.totalorder %v30_v47, 2 }
  0x53   :  { %v203_v55 = vmul.f32 -0.001358992, %v202_v53  ;;  %v210_v56 = vmul.f32 -0.00019511016, %v202_v53 }
  0x55   :  { %v204_v57 = vadd.f32 0.041655596, %v203_v55  ;;  %v211_v58 = vadd.f32 0.008332121, %v210_v56  ;;  %v272_v35 = vpop.eup %271 }
  0x56   :  { %v62_v36 = vadd.f32 1.0, %v272_v35  ;;  %v65_v10 = vmul.f32 -0.5, %v272_v35  ;;  %v68_v39 = vand.u32 2147483647, %v272_v35 }
  0x57   :  { %v205_v60 = vmul.f32 %v204_v57, %v202_v53  ;;  %v212_v61 = vmul.f32 %v211_v58, %v202_v53 }
  0x58   :  { %273 = vlog2.f32 %v62_v36  ;;  %v66_v37 = vadd.f32 1.0, %v65_v10  ;;  %vm69_vm3 = vcmp.lt.f32.partialorder %v68_v39, 0.0004427343 }
  0x59   :  { %v206_v62 = vadd.f32 -0.4999988, %v205_v60  ;;  %v213_v63 = vadd.f32 -0.16666654, %v212_v61 }
  0x5a   :  { %v67_v28 = vmul.f32 %v272_v35, %v66_v37 }
  0x5b   :  { %v207_v2 = vmul.f32 %v206_v62, %v202_v53  ;;  %v214_v4 = vmul.f32 %v213_v63, %v202_v53 }
  0x5d   :  { %v208_v3 = vadd.f32 1.0, %v207_v2  ;;  %v215_v5 = vadd.f32 1.0, %v214_v4 }
  0x5e   :  { %v274_v38 = vpop.eup %273 }
  0x5f   :  { %v216_v6 = vmul.f32 %v215_v5, %v200_v52  ;;  %v225_v7 = vxor.u32 2147483648, %v208_v3  ;;  %v64_v40 = vmul.f32 0.6931472, %v274_v38 }
  0x61   :  { %v222_v8 = vxor.u32 2147483648, %v216_v6  ;;  %v226_v9 = vsel %vm224_vm14, %v225_v7, %v216_v6  ;;  %v70_v42 = vsel %vm69_vm3, %v67_v28, %v64_v40 }
  0x62   :  { %v71_v44 = vadd.f32 %v70_v42, %v57_v41 }
  0x63   :  { %v223_v11 = vsel %vm221_vm15, %v208_v3, %v222_v8 }
  0x64   :  { %v227_v12 = vsel %vm220_vm0, %v223_v11, %v226_v9  ;;  %v72_v46 = vsub.f32 0.0, %v71_v44 }
  0x65   :  { %v228_v13 = vsel %vm217_vm1, nan, %v227_v12 }
  0x66   :  { %230 = vrot.lane.b32.xlu0 %v228_v13, %s335_s0  ;;  %v73_v48 = vadd.f32 0.1, %v72_v46 }
  0xd8   :  { %v231_v49 = vpop.permute.xlu0 %230 }
  0xd9   :  { %v233_v50 = vadd.f32 %v231_v49, %v73_v48 }
  0xdb   :  { %v234_v51 = vsel %vm38_vm4, %v233_v50, %v350_v0 }
  0xdc   :  { %235 = vst [vmem:[#allocation5] sm:$0xff] %v234_v51 }
  0xdd   :  { %246 = dma.vmem_to_hbm [thread:$0]  %s242_s12, 128, %s244_s15, [#allocation4]  }
  0xde   :  { %325 = dma.done.wait [#allocation4], 128  }
  0xdf   :  { %326 = vsyncadd [#allocation4], 4294967168 }
  0xe0   :  { %251 = vsyncpa [#allocation3], 1 }
  0xe1   :  { %252 = vsyncpa [#allocation4], 1 }

</bundles_post_ra>
